<compile_context>
chip_gen: v6e
topology: v6e:2x2x1
jax: 0.10.0
libtpu: 0.0.40
codegen_flags: <defaults>
</compile_context>

<pallas_src>
import functools

import jax
import jax.numpy as jnp
from jax import lax
from jax.experimental import pallas as pl
from jax.experimental.pallas import tpu as pltpu

_SUB_TN = 512    # compute sub-chunk width (lanes); multiple of 128
_SMALL_N = 512   # at or below this, a single unmasked tile covers all points


# --------------------------------------------------------------------------
# Kernel
# --------------------------------------------------------------------------
def _merge_point_kernel(x_ref, w_ref, b_ref, out_ref, acc_ref, *,
                        n_total, tn, sub_tn):
    """One (batch b, points-tile k) grid step.

    x_ref  : (Cin, TN)      points tile (channels on sublanes, points on lanes)
    w_ref  : (Cout, Cin)    1x1-conv weight (torch layout, kernel dim squeezed)
    b_ref  : (Cout, 1)      bias
    out_ref: (Cout, 1)      per-batch global feature, written only at k == last
    acc_ref: (Cout, sub_tn) f32 scratch: lane-dense running max, resident
                            across the k (reduction) grid axis
    """
    k = pl.program_id(1)
    nk = pl.num_programs(1)
    n_sub = tn // sub_tn

    @pl.when(k == 0)
    def _init():
        acc_ref[...] = jnp.full(acc_ref.shape, -jnp.inf, dtype=acc_ref.dtype)

    w = w_ref[...]

    def fold_tile(masked):
        def body(i, carry):
            if n_sub == 1:
                xs = x_ref[...]
            else:
                start = pl.multiple_of(i * sub_tn, sub_tn)
                xs = x_ref[:, pl.ds(start, sub_tn)]
            # Pointwise conv of this sub-chunk on the MXU:
            # (Cout, Cin) @ (Cin, sub_tn) -> (Cout, sub_tn), f32 accumulation.
            y = jnp.dot(w, xs, preferred_element_type=jnp.float32)
            if masked:
                # Discard lanes past N (DMA-padded garbage) with -inf.
                valid = n_total - (k * tn + i * sub_tn)
                lane = lax.broadcasted_iota(jnp.int32, y.shape, 1)
                y = jnp.where(lane < valid, y, -jnp.inf)
            # Pure-VPU elementwise fold into the lane-dense accumulator
            # (no cross-lane reduce, no narrow store in the hot loop).
            acc_ref[...] = jnp.maximum(acc_ref[...], y)
            return carry

        lax.fori_loop(0, n_sub, body, 0, unroll=min(n_sub, 8))

    if n_total % tn != 0:
        # Only the final tile contains padded lanes: steady state is unmasked.
        @pl.when(k < nk - 1)
        def _steady():
            fold_tile(masked=False)

        @pl.when(k == nk - 1)
        def _last():
            fold_tile(masked=True)
    else:
        fold_tile(masked=False)

    @pl.when(k == nk - 1)
    def _finalize():
        # One cross-lane reduce + bias (hoisted out of the reduction:
        # max(xW) + b == max(xW + b)) + the single width-1 store per batch.
        g = jnp.max(acc_ref[...], axis=1, keepdims=True) + b_ref[...]
        out_ref[...] = g.astype(out_ref.dtype)


# --------------------------------------------------------------------------
# Tile sizing
# --------------------------------------------------------------------------
@functools.lru_cache(maxsize=None)
def _vmem_capacity_bytes():
    try:
        cap = getattr(pltpu.get_tpu_info(), "vmem_capacity_bytes", None)
        if cap:
            return int(cap)
    except Exception:
        pass
    return 64 * 1024 * 1024  # conservative fallback: v7x per-TC physical VMEM


def _pick_tiles(n, cin, x_itemsize, point_tile=None, sub_tile=None):
    """Pick (TN, SUB_TN) for the points axis.

    TN (DMA tile) is sized from a per-generation VMEM budget covering the
    double-buffered (Cin, TN) x tile; SUB_TN bounds the in-kernel matmul
    intermediate.  TN is always a multiple of SUB_TN (itself 128-aligned), so
    in-kernel slicing never leaves the VMEM block; the only non-aligned case
    is the single-tile path where the block equals the full points dim.
    """
    if n <= _SMALL_N and point_tile is None:
        return n, n  # one tile == full points dim; no padding, no mask

    sub_tn = _SUB_TN if sub_tile is None else sub_tile
    sub_tn = max(128, (sub_tn // 128) * 128)
    sub_tn = min(sub_tn, -(-n // 128) * 128)

    if point_tile is None:
        # ~1/6 of physical VMEM per x buffer (x is double-buffered), capped at
        # 12 MiB: >=90% of the HBM roofline on v5e/v6e/v7x while leaving room
        # for the accumulator, weights and compiler scratch on v7x's 64 MiB.
        per_buffer_budget = min(_vmem_capacity_bytes() // 6, 12 * 1024 * 1024)
        tn = per_buffer_budget // max(1, cin * x_itemsize)
    else:
        tn = point_tile

    tn = max(sub_tn, (tn // sub_tn) * sub_tn)       # multiple of SUB_TN
    n_ceil = -(-n // sub_tn) * sub_tn               # don't exceed padded N
    return min(tn, n_ceil), sub_tn


# --------------------------------------------------------------------------
# Wrappers
# --------------------------------------------------------------------------
def merge_point_global_feat(x_ncl, weight, bias_col, *, stream_dtype=None,
                            point_tile=None, sub_tile=None):
    """Fused 1x1 conv + max over points, consuming the NCL layout directly.

    x_ncl       : (B, Cin, N)  float32 (or bf16)
    weight      : (Cout, Cin)  float32
    bias_col    : (Cout, 1)    float32
    stream_dtype: optional dtype (e.g. jnp.bfloat16) to stream x / weight in,
                  halving the HBM read; accumulation stays f32 on the MXU.
    returns (B, Cout, 1) float32
    """
    if stream_dtype is not None:
        x_ncl = x_ncl.astype(stream_dtype)
        weight = weight.astype(stream_dtype)

    B, Cin, N = x_ncl.shape
    Cout = weight.shape[0]
    tn, sub_tn = _pick_tiles(N, Cin, x_ncl.dtype.itemsize,
                             point_tile=point_tile, sub_tile=sub_tile)
    nk = pl.cdiv(N, tn)

    kernel = functools.partial(_merge_point_kernel,
                               n_total=N, tn=tn, sub_tn=sub_tn)

    # Explicit scoped-VMEM limit: double-buffered x tile + accumulator +
    # params + headroom, so large tiles never exceed the generation-dependent
    # default (16 MiB v5e / 32 MiB v6e,v7x) nor the physical capacity.
    x_bytes = 2 * Cin * tn * x_ncl.dtype.itemsize
    acc_bytes = Cout * sub_tn * 4
    misc_bytes = 4 * Cout * (Cin + 2) * 4
    vmem_limit = x_bytes + acc_bytes + misc_bytes + (8 << 20)
    vmem_limit = max(vmem_limit, 32 << 20)
    vmem_limit = min(vmem_limit, int(_vmem_capacity_bytes() * 0.9))

    return pl.pallas_call(
        kernel,
        out_shape=jax.ShapeDtypeStruct((B, Cout, 1), jnp.float32),
        grid_spec=pltpu.PrefetchScalarGridSpec(
            num_scalar_prefetch=0,
            grid=(B, nk),
            in_specs=[
                # squeeze batch dim: kernel sees (Cin, TN), points on lanes
                pl.BlockSpec((None, Cin, tn), lambda b, k: (b, 0, k)),
                pl.BlockSpec((Cout, Cin), lambda b, k: (0, 0)),
                pl.BlockSpec((Cout, 1), lambda b, k: (0, 0)),
            ],
            # Same block for all k -> resident across the reduction axis.
            out_specs=pl.BlockSpec((None, Cout, 1), lambda b, k: (b, 0, 0)),
            scratch_shapes=[pltpu.VMEM((Cout, sub_tn), jnp.float32)],
        ),
        compiler_params=pltpu.CompilerParams(
            dimension_semantics=("parallel", "arbitrary"),
            vmem_limit_bytes=vmem_limit,
        ),
    )(x_ncl, weight, bias_col)


def merge_point_forward(x_ncl, skip_ncl, weight, bias, *, stream_dtype=None):
    """Full MergePoint.forward.

    x_ncl   : (B, Cin, N)    PyTorch NCL layout
    skip_ncl: (B, Cskip, M)  PyTorch NCL layout
    weight  : (Cout, Cin)    Conv1d weight with the kernel dim squeezed
    bias    : (Cout,)
    returns (B, Cout + Cskip, M) in NCL layout, matching the torch module.
    """
    B, _, _ = x_ncl.shape
    _, _, M = skip_ncl.shape
    Cout = weight.shape[0]

    g = merge_point_global_feat(x_ncl, weight, bias.reshape(Cout, 1),
                                stream_dtype=stream_dtype)  # (B, Cout, 1)

    # Glue (pure data movement). NOTE: the concat re-reads / re-writes all of
    # `skip`; consumers that can fuse downstream should use
    # merge_point_global_feat() and keep (g, skip) separate instead.
    g_rep = jnp.broadcast_to(g.astype(skip_ncl.dtype), (B, Cout, M))
    return jnp.concatenate([g_rep, skip_ncl], axis=1)


# --------------------------------------------------------------------------
# Demo / self-check
# --------------------------------------------------------------------------
if __name__ == "__main__":
    key = jax.random.PRNGKey(0)
    k_x, k_skip, k_w, k_b, k_x2 = jax.random.split(key, 5)

    B = 2
    in_channel = 8      # Cin
    skip_channel = 16   # Cout of the 1x1 conv
    N = 16              # points in x
    M = 8               # points in skip
    Cskip = 16          # channels of the skip tensor

    x = jax.random.normal(k_x, (B, in_channel, N), dtype=jnp.float32)
    skip = jax.random.normal(k_skip, (B, Cskip, M), dtype=jnp.float32)
    weight = 0.05 * jax.random.normal(
        k_w, (skip_channel, in_channel), dtype=jnp.float32)
    bias = 0.01 * jax.random.normal(k_b, (skip_channel,), dtype=jnp.float32)

    # 1) Full forward at the module's small shapes (single-tile path).
    out = jax.block_until_ready(merge_point_forward(x, skip, weight, bias))
    ref_conv = jnp.einsum("bin,oi->bon", x, weight) + bias[None, :, None]
    ref_g = jnp.max(ref_conv, axis=2, keepdims=True)
    ref = jnp.concatenate(
        [jnp.broadcast_to(ref_g, (B, skip_channel, M)), skip], axis=1)
    assert out.shape == (B, skip_channel + Cskip, M), out.shape
    assert jnp.allclose(out, ref, atol=1e-5, rtol=1e-5)

    # 2) Exercise the tiled reduction (multi-tile grid, masked last tile) and
    #    the in-kernel sub-chunk loop on a ragged point count.
    N2 = 1300
    x2 = jax.random.normal(k_x2, (B, in_channel, N2), dtype=jnp.float32)
    ref_g2 = jnp.max(
        jnp.einsum("bin,oi->bon", x2, weight) + bias[None, :, None],
        axis=2, keepdims=True)
    for pt, st in ((512, 512), (1024, 512)):
        g2 = merge_point_global_feat(
            x2, weight, bias.reshape(skip_channel, 1),
            point_tile=pt, sub_tile=st)
        g2 = jax.block_until_ready(g2)
        assert g2.shape == (B, skip_channel, 1), g2.shape
        assert jnp.allclose(g2, ref_g2, atol=1e-4, rtol=1e-4), (pt, st)

    print("KERNEL_OK")
</pallas_src>

<mosaic_0001>
module attributes {stable_mosaic.version = 11 : i64} {
  func.func @_merge_point_kernel(%arg0: i32, %arg1: i32, %arg2: memref<1x8x16xf32, #tpu.memory_space<vmem>>, %arg3: memref<16x8xf32, #tpu.memory_space<vmem>>, %arg4: memref<16x1xf32, #tpu.memory_space<vmem>>, %arg5: memref<1x16x1xf32, #tpu.memory_space<vmem>>, %arg6: memref<16x16xf32, #tpu.memory_space<vmem>>) attributes {dimension_semantics = [#tpu.dimension_semantics<parallel>, #tpu.dimension_semantics<arbitrary>], iteration_bounds = array<i64: 2, 1>, scalar_prefetch = 0 : i64, scratch_operands = 1 : i64, tpu.core_type = #tpu.core_type<tc>, window_params = [{transform_indices = @transform_0, window_bounds = array<i64: 1, 8, 16>}, {pipeline_mode = #tpu.pipeline_mode<synchronous>, transform_indices = @transform_1, window_bounds = array<i64: 16, 8>}, {pipeline_mode = #tpu.pipeline_mode<synchronous>, transform_indices = @transform_2, window_bounds = array<i64: 16, 1>}, {transform_indices = @transform_3, window_bounds = array<i64: 1, 16, 1>}]} {
    %c0_i32 = arith.constant 0 : i32
    %0 = arith.cmpi eq, %arg1, %c0_i32 : i32
    %1 = arith.extui %0 : i1 to i32
    %c0_i32_0 = arith.constant 0 : i32
    %2 = arith.cmpi ne, %1, %c0_i32_0 : i32
    scf.if %2 {
      %cst_12 = arith.constant 0xFF800000 : f32
      %13 = vector.broadcast %cst_12 : f32 to vector<16x16xf32>
      %c0_13 = arith.constant 0 : index
      %c0_14 = arith.constant 0 : index
      %14 = vector.load %arg6[%c0_13, %c0_14] : memref<16x16xf32, #tpu.memory_space<vmem>>, vector<16x16xf32>
      tpu.vector_store %arg6[%c0_13, %c0_14], %13 {strides = array<i32>} : memref<16x16xf32, #tpu.memory_space<vmem>>, vector<16x16xf32>,
    } else {
    }
    %c0 = arith.constant 0 : index
    %c0_1 = arith.constant 0 : index
    %3 = vector.load %arg3[%c0, %c0_1] : memref<16x8xf32, #tpu.memory_space<vmem>>, vector<16x8xf32>
    %c0_i32_2 = arith.constant 0 : i32
    %c0_3 = arith.constant 0 : index
    %c0_4 = arith.constant 0 : index
    %c0_5 = arith.constant 0 : index
    %4 = vector.load %arg2[%c0_3, %c0_4, %c0_5] : memref<1x8x16xf32, #tpu.memory_space<vmem>>, vector<1x8x16xf32>
    %5 = vector.shape_cast %4 : vector<1x8x16xf32> to vector<8x16xf32>
    %cst = arith.constant dense<0.000000e+00> : vector<16x16xf32>
    %6 = tpu.matmul %3, %5, %cst {dimension_numbers = #tpu.dot_dimension_numbers<[1], [0], [0], [1], [0, 0, 1, 1], [], []>} : vector<16x8xf32>, vector<8x16xf32>, vector<16x16xf32> -> vector<16x16xf32>
    %c0_6 = arith.constant 0 : index
    %c0_7 = arith.constant 0 : index
    %7 = vector.load %arg6[%c0_6, %c0_7] : memref<16x16xf32, #tpu.memory_space<vmem>>, vector<16x16xf32>
    %8 = arith.maximumf %7, %6 : vector<16x16xf32>
    %c0_8 = arith.constant 0 : index
    %c0_9 = arith.constant 0 : index
    %9 = vector.load %arg6[%c0_8, %c0_9] : memref<16x16xf32, #tpu.memory_space<vmem>>, vector<16x16xf32>
    tpu.vector_store %arg6[%c0_8, %c0_9], %8 {strides = array<i32>} : memref<16x16xf32, #tpu.memory_space<vmem>>, vector<16x16xf32>,
    %c0_i32_10 = arith.constant 0 : i32
    %10 = arith.cmpi eq, %arg1, %c0_i32_10 : i32
    %11 = arith.extui %10 : i1 to i32
    %c0_i32_11 = arith.constant 0 : i32
    %12 = arith.cmpi ne, %11, %c0_i32_11 : i32
    scf.if %12 {
      %c0_12 = arith.constant 0 : index
      %c0_13 = arith.constant 0 : index
      %13 = vector.load %arg6[%c0_12, %c0_13] : memref<16x16xf32, #tpu.memory_space<vmem>>, vector<16x16xf32>
      %cst_14 = arith.constant dense<0xFF800000> : vector<16xf32>
      %14 = vector.multi_reduction <maximumf>, %13, %cst_14 [1] : vector<16x16xf32> to vector<16xf32>
      %15 = vector.shape_cast %14 : vector<16xf32> to vector<16x1xf32>
      %c0_15 = arith.constant 0 : index
      %c0_16 = arith.constant 0 : index
      %16 = vector.load %arg4[%c0_15, %c0_16] : memref<16x1xf32, #tpu.memory_space<vmem>>, vector<16x1xf32>
      %17 = arith.addf %15, %16 : vector<16x1xf32>
      %c0_17 = arith.constant 0 : index
      %c0_18 = arith.constant 0 : index
      %c0_19 = arith.constant 0 : index
      %18 = vector.load %arg5[%c0_17, %c0_18, %c0_19] : memref<1x16x1xf32, #tpu.memory_space<vmem>>, vector<1x16x1xf32>
      %19 = vector.shape_cast %18 : vector<1x16x1xf32> to vector<16x1xf32>
      %20 = vector.shape_cast %17 : vector<16x1xf32> to vector<1x16x1xf32>
      tpu.vector_store %arg5[%c0_17, %c0_18, %c0_19], %20 {strides = array<i32>} : memref<1x16x1xf32, #tpu.memory_space<vmem>>, vector<1x16x1xf32>,
    } else {
    }
    return
  }
  func.func @transform_0(%arg0: i32, %arg1: i32) -> (i32, i32, i32) {
    %c0_i32 = arith.constant 0 : i32
    %c0_i32_0 = arith.constant 0 : i32
    return %arg0, %c0_i32, %arg1 : i32, i32, i32
  }
  func.func @transform_1(%arg0: i32, %arg1: i32) -> (i32, i32) {
    %c0_i32 = arith.constant 0 : i32
    %c0_i32_0 = arith.constant 0 : i32
    %c0_i32_1 = arith.constant 0 : i32
    return %c0_i32, %c0_i32_0 : i32, i32
  }
  func.func @transform_2(%arg0: i32, %arg1: i32) -> (i32, i32) {
    %c0_i32 = arith.constant 0 : i32
    %c0_i32_0 = arith.constant 0 : i32
    %c0_i32_1 = arith.constant 0 : i32
    return %c0_i32, %c0_i32_0 : i32, i32
  }
  func.func @transform_3(%arg0: i32, %arg1: i32) -> (i32, i32, i32) {
    %c0_i32 = arith.constant 0 : i32
    %c0_i32_0 = arith.constant 0 : i32
    %c0_i32_1 = arith.constant 0 : i32
    return %arg0, %c0_i32, %c0_i32_0 : i32, i32, i32
  }
}

</mosaic_0001>

<bundles_post_ra>
// kernel: tpu_custom_call.1
= control target key start
LH: loop header
LB: loop body
LE: loop exit
PB: predicated region body
PF: predicated region fallthrough
CT: control target
= control target key end

     0   :  { %s465_s12 = smov 0   ;;  %s467_s13 = smov 0   ;;  %s516_s0 = inlined_call_operand.vmem [shape: f32[2,8,16], index: 0, kind: input, shape index: {}]   ;;  %s517_s1 = inlined_call_operand.vmem [shape: f32[16,8], index: 1, kind: input, shape index: {}]   ;;  %s518_s2 = inlined_call_operand.vmem [shape: f32[16,1], index: 2, kind: input, shape index: {}]   ;;  %s519_s3 = inlined_call_operand.vmem [shape: f32[2,16,1], index: 3, kind: output, shape index: {}]  }
   0x1   :  { %s469_s14 = smov 0  }
   0x2 LB: > { %s25_s15 = sadd.s32 1, %s438_s13  ;;  %p378_p0 = scmp.ge.s32.totalorder %s442_s14, 1  ;;  %s442_s14 = sphi %s469_s14, %s13_s14   ;;  %s438_s13 = sphi %s467_s13, %s521_s13   ;;  %s434_s12 = sphi %s465_s12, %s520_s12  }
   0x3   : > { %p27_p1 = scmp.ge.s32.totalorder %s25_s15, 2  ;;  %p153_p2 = scmp.lt.s32.totalorder %s442_s14, 3 }
   0x5   : > { %s523_s15 = smov (%p27_p1, %s25_s15), 0  ;;  %p154_p3 = pnand %p378_p0, %p153_p2 }
   0x6   : > { %p179_p4 = scmp.lt.s32.totalorder (!%p154_p3), %s434_s12, 1 }
   0x7   : > { %157 = sbr.rel (%p154_p3) target bundleno = 369 (0x171), region = 32 }
   0xc   : > { %v198_v0 = vld [vmem:[%s517_s1] sm:$0xff]  ;;  %vm201_vm0 = vcmask 64512   ;;  %vm195_vm1 = vcmask 130048   ;;  %v444_v1 = vmov -inf   ;;  %s525_s12 = smov (!%p179_p4, %s434_s12), 1  ;;  %v199_v3 = vld [vmem:[%s517_s1 + $0x8] sm:$0xff] }
   0xd   : > { %392 = vmatprep.mubr.msk.f32.mxu0 %vm201_vm0, %v198_v0  ;;  %197 = vst.msk [vmem:[#allocation2 + $0x8] sm:$0xff] %vm195_vm1, %v444_v1  ;;  %196 = vst.msk [vmem:[#allocation2] sm:$0xff] %vm195_vm1, %v444_v1  ;;  %s379_s18 = sshll.u32 %s525_s12, 3  ;;  %s386_s24 = sshll.u32 %s525_s12, 4  ;;  %v301_v14 = vld [vmem:[%s518_s2] sm:$0xff]  ;;  %vm305_vm2 = vcmask 7168  }
   0xe   : > { %s185_s21 = scalar_lea.vmem %s516_s0, %s379_s18  ;;  %s190_s29 = scalar_lea.vmem %s519_s3, %s386_s24  ;;  %v302_v17 = vld [vmem:[%s518_s2 + $0x8] sm:$0xff] }
   0xf   : > { %v200_v2 = vld [vmem:[%s185_s21] sm:$0xff] }
  0x10   : > { %390 = vmatprep.subr.mxu0 %v200_v2 }
  0x11   : > { %391 = vmatpush3.msra.mxu0 %v200_v2 }
  0x12   : > { %393 = vmatmul.mubr.msk.f32.vlgmr.msra.gmra.mxu0 %vm201_vm0, %v199_v3 }
  0x14   : > { %v284_v4 = vld [vmem:[#allocation2 + $0x8] sm:$0xff]  ;;  %v283_v6 = vld [vmem:[#allocation2] sm:$0xff] }
  0xd2   : > { %v394_v5 = vpop.f32.mrf.mxu0 }
  0xd3   : > { %v286_v7 = vmax.f32 %v284_v4, %v394_v5 }
  0xd4   : > { %v274_v8 = vpop.f32.mrf.mxu0 }
  0xd5   : > { %289 = vst.msk [vmem:[#allocation2 + $0x8] sm:$0xff] %vm195_vm1, %v286_v7  ;;  %v285_v9 = vmax.f32 %v283_v6, %v274_v8 }
  0xd7   : > { %288 = vst.msk [vmem:[#allocation2] sm:$0xff] %vm195_vm1, %v285_v9 }
  0xdc   : > { %v294_v12 = vld [vmem:[#allocation2 + $0x8] sm:$0xff] }
  0xdd   : > { %v298_v13 = vsel %vm195_vm1, %v294_v12, -inf }
  0xde   : > { %v293_v10 = vld [vmem:[#allocation2] sm:$0xff] }
  0xdf   : > { %v295_v11 = vsel %vm195_vm1, %v293_v10, -inf }
  0xe0   : > { %296 = vmax.xlane.f32.xlu0 %v295_v11 }
  0xe4   : > { %299 = vmax.xlane.f32.xlu0 %v298_v13 }
 0x169   : > { %v297_v15 = vpop.xlane.xlu0 %296 }
 0x16a   : > { %v303_v16 = vadd.f32 %v301_v14, %v297_v15 }
 0x16c   : > { %306 = vst.msk [vmem:[%s190_s29] sm:$0xff] %vm305_vm2, %v303_v16 }
 0x16d   : > { %v300_v18 = vpop.xlane.xlu0 %299 }
 0x16e   : > { %v304_v19 = vadd.f32 %v302_v17, %v300_v18 }
 0x170   : > { %307 = vst.msk [vmem:[%s190_s29 + $0x8] sm:$0xff] %vm305_vm2, %v304_v19 }
 0x171 PF: > { %s13_s14 = sadd.s32 1, %s442_s14   ;;  %s520_s12 = smov %s438_s13 }
 0x172   : > { %p10_p5 = scmp.ge.s32.totalorder %s13_s14, 4   ;;  %s521_s13 = smov %s523_s15 }
 0x174   :  { %12 = sbr.rel (!%p10_p5) target bundleno = 2 (0x2), region = 70 }

</bundles_post_ra>
